<compile_context>
chip_gen: v5e
topology: v5e:2x2
jax: 0.10.0
libtpu: 0.0.40
codegen_flags: <defaults>
</compile_context>

<pallas_src>
import functools

import jax
import jax.numpy as jnp
from jax.experimental import pallas as pl
from jax.experimental.pallas import tpu as pltpu


def _round_up(x, m):
    return (x + m - 1) // m * m


def _pick_tile(n_pad, max_tile, align=128):
    """Largest multiple of `align` that divides n_pad and is <= max_tile."""
    t = max(align, (min(max_tile, n_pad) // align) * align)
    while n_pad % t:
        t -= align
    return t


def gcn_layer_kernel(adj_ref, x_ref, w_ref, b_ref, o_ref, acc_ref, *, relu):
    """One GCN layer, tiled over (row tile i, contraction tile k).

    adj_ref : (tm, tk)   bf16  -- streamed tile of the normalized adjacency Â
    x_ref   : (tk, Fin)  bf16  -- K-tile of node features
    w_ref   : (Fin, Dout) bf16 -- layer weight (resident)
    b_ref   : (1, Dout)  f32   -- bias (resident)
    o_ref   : (tm, Dout)       -- output row tile
    acc_ref : (tm, Dout) f32   -- VMEM accumulator across the K axis
    """
    k = pl.program_id(1)

    @pl.when(k == 0)
    def _():
        acc_ref[...] = jnp.zeros_like(acc_ref)

    # Tiny projection of this K-tile (recomputed per row tile; hidden under the
    # adjacency DMA since the layer is memory-bound on Â).
    xw = jnp.dot(x_ref[...], w_ref[...], preferred_element_type=jnp.float32)
    xw = xw.astype(adj_ref.dtype)  # bf16 operand for the big MXU matmul

    # Partial aggregation: Â[i-tile, k-tile] @ (X[k-tile] @ W), f32 accumulate.
    acc_ref[...] += jnp.dot(adj_ref[...], xw, preferred_element_type=jnp.float32)

    @pl.when(k == pl.num_programs(1) - 1)
    def _():
        r = acc_ref[...] + b_ref[...]
        if relu:
            r = jnp.maximum(r, 0.0)
        o_ref[...] = r.astype(o_ref.dtype)


def gcn_layer(adj, x, w, b, *, tm, tk, relu, out_dtype):
    """Row/col-tiled pallas_call for one fused GCN layer: [relu](Â (X W) + b)."""
    n_pad = adj.shape[0]
    fin = x.shape[1]
    dout = w.shape[1]
    nti = n_pad // tm
    ntk = n_pad // tk

    flops = 2 * n_pad * n_pad * dout + nti * 2 * n_pad * fin * dout
    bytes_accessed = (
        adj.size * adj.dtype.itemsize                    # streamed adjacency (once)
        + nti * x.size * x.dtype.itemsize                # features re-streamed per row tile
        + w.size * w.dtype.itemsize
        + b.size * b.dtype.itemsize
        + n_pad * dout * jnp.dtype(out_dtype).itemsize
    )

    return pl.pallas_call(
        functools.partial(gcn_layer_kernel, relu=relu),
        out_shape=jax.ShapeDtypeStruct((n_pad, dout), out_dtype),
        grid=(nti, ntk),
        in_specs=[
            pl.BlockSpec((tm, tk), lambda i, k: (i, k)),    # Â tile (streams)
            pl.BlockSpec((tk, fin), lambda i, k: (k, 0)),   # X K-tile
            pl.BlockSpec((fin, dout), lambda i, k: (0, 0)),  # W (resident)
            pl.BlockSpec((1, dout), lambda i, k: (0, 0)),    # b (resident)
        ],
        out_specs=pl.BlockSpec((tm, dout), lambda i, k: (i, 0)),
        scratch_shapes=[pltpu.VMEM((tm, dout), jnp.float32)],
        compiler_params=pltpu.CompilerParams(
            dimension_semantics=("parallel", "arbitrary"),   # 2 TCs split row tiles
            vmem_limit_bytes=32 * 1024 * 1024,
        ),
        cost_estimate=pl.CostEstimate(
            flops=flops, transcendentals=0, bytes_accessed=bytes_accessed
        ),
    )(adj, x, w, b)


def build_norm_adj(edge_index, num_nodes, num_nodes_pad, dtype=jnp.bfloat16):
    """Dense Â = D^-1/2 (A + I) D^-1/2, zero-padded to (num_nodes_pad)^2."""
    src, dst = edge_index[0], edge_index[1]
    loop = jnp.arange(num_nodes, dtype=edge_index.dtype)
    src = jnp.concatenate([src, loop])
    dst = jnp.concatenate([dst, loop])
    # A[target, source] = 1 (messages flow source -> target, as in PyG)
    a = jnp.zeros((num_nodes_pad, num_nodes_pad), jnp.float32).at[dst, src].add(1.0)
    deg = a.sum(axis=1)
    dinv_sqrt = jnp.where(deg > 0, jax.lax.rsqrt(deg), 0.0)
    return (dinv_sqrt[:, None] * a * dinv_sqrt[None, :]).astype(dtype)


def encoder_forward(mesh_node, edge_index, material_params, params):
    w1, b1, wmu, bmu, wlv, blv = params
    n = mesh_node.shape[0]
    latent_dim = wmu.shape[1]

    # glue: feature concat (torch.cat dim=1)
    x = jnp.concatenate([mesh_node, material_params], axis=1)

    # pad N to a lane-aligned size, pick tiles that divide it
    n_pad = _round_up(n, 128)
    tm = _pick_tile(n_pad, 512)     # output row tile (parallel axis)
    tk = _pick_tile(n_pad, 2048)    # contraction tile (arbitrary axis)

    adj = build_norm_adj(edge_index, n, n_pad, dtype=jnp.bfloat16)
    x_p = jnp.zeros((n_pad, x.shape[1]), jnp.bfloat16).at[:n].set(
        x.astype(jnp.bfloat16))

    # fuse mu / logvar heads into one (H, 2L) weight -> single second Â pass
    wcat = jnp.concatenate([wmu, wlv], axis=1).astype(jnp.bfloat16)
    bcat = jnp.concatenate([bmu, blv], axis=1).astype(jnp.float32)

    # layer 1: h = relu(Â @ (X @ W1) + b1), kept in bf16 (feeds next bf16 matmul)
    h = gcn_layer(adj, x_p, w1.astype(jnp.bfloat16), b1.astype(jnp.float32),
                  tm=tm, tk=tk, relu=True, out_dtype=jnp.bfloat16)

    # layer 2 (fused heads): [mu | logvar] = Â @ (h @ [Wmu|Wlv]) + [bmu|blv]
    out = gcn_layer(adj, h, wcat, bcat, tm=tm, tk=tk, relu=False,
                    out_dtype=jnp.float32)

    mu = out[:n, :latent_dim]
    logvar = out[:n, latent_dim:2 * latent_dim]
    return mu, logvar


def _reference_forward(mesh_node, edge_index, material_params, params):
    """Plain-JAX f32 reference (same semantics, no Pallas / bf16)."""
    w1, b1, wmu, bmu, wlv, blv = params
    n = mesh_node.shape[0]
    x = jnp.concatenate([mesh_node, material_params], axis=1)
    adj = build_norm_adj(edge_index, n, n, dtype=jnp.float32)
    h = jnp.maximum(adj @ (x @ w1) + b1, 0.0)
    mu = adj @ (h @ wmu) + bmu
    logvar = adj @ (h @ wlv) + blv
    return mu, logvar


if __name__ == "__main__":
    # small, forward-consistent shapes
    N = 16               # number of mesh nodes
    input_dim = 4        # mesh_node features
    material_dim = 4     # material_params features
    hidden_dim = 32
    latent_dim = 16

    key = jax.random.PRNGKey(0)
    k = jax.random.split(key, 8)

    def glorot(kk, shape):
        lim = (6.0 / (shape[0] + shape[1])) ** 0.5
        return jax.random.uniform(kk, shape, jnp.float32, -lim, lim)

    # GCNConv params (PyG inits bias to zeros; small random biases here to
    # exercise the bias path in the test). Biases kept 2-D (1, out).
    w1 = glorot(k[0], (input_dim + material_dim, hidden_dim))
    b1 = 0.1 * jax.random.normal(k[5], (1, hidden_dim), jnp.float32)
    wmu = glorot(k[1], (hidden_dim, latent_dim))
    bmu = 0.1 * jax.random.normal(k[6], (1, latent_dim), jnp.float32)
    wlv = glorot(k[2], (hidden_dim, latent_dim))
    blv = 0.1 * jax.random.normal(k[7], (1, latent_dim), jnp.float32)
    params = (w1, b1, wmu, bmu, wlv, blv)

    mesh_node = jax.random.normal(k[3], (N, input_dim), jnp.float32)
    material_params = jax.random.normal(k[4], (N, material_dim), jnp.float32)

    # deterministic bidirectional ring graph: (2, E) int32 edge_index
    idx = jnp.arange(N, dtype=jnp.int32)
    src = jnp.concatenate([idx, (idx + 1) % N])
    dst = jnp.concatenate([(idx + 1) % N, idx])
    edge_index = jnp.stack([src, dst], axis=0)

    mu, logvar = encoder_forward(mesh_node, edge_index, material_params, params)
    jax.block_until_ready((mu, logvar))
    assert mu.shape == (N, latent_dim) and logvar.shape == (N, latent_dim)

    # numerical sanity check against the plain-JAX f32 reference (bf16 tolerance)
    mu_ref, lv_ref = _reference_forward(mesh_node, edge_index, material_params, params)
    assert jnp.allclose(mu, mu_ref, atol=7.5e-2, rtol=7.5e-2)
    assert jnp.allclose(logvar, lv_ref, atol=7.5e-2, rtol=7.5e-2)

    print("KERNEL_OK")
</pallas_src>

<mosaic_0001>
module attributes {stable_mosaic.version = 11 : i64} {
  func.func @gcn_layer_kernel(%arg0: i32, %arg1: i32, %arg2: memref<128x128xbf16, #tpu.memory_space<vmem>>, %arg3: memref<128x8xbf16, #tpu.memory_space<vmem>>, %arg4: memref<8x32xbf16, #tpu.memory_space<vmem>>, %arg5: memref<1x32xf32, #tpu.memory_space<vmem>>, %arg6: memref<128x32xbf16, #tpu.memory_space<vmem>>, %arg7: memref<128x32xf32, #tpu.memory_space<vmem>>) attributes {dimension_semantics = [#tpu.dimension_semantics<parallel>, #tpu.dimension_semantics<arbitrary>], iteration_bounds = array<i64: 1, 1>, scalar_prefetch = 0 : i64, scratch_operands = 1 : i64, tpu.core_type = #tpu.core_type<tc>, window_params = [{transform_indices = @transform_0, window_bounds = array<i64: 128, 128>}, {transform_indices = @transform_1, window_bounds = array<i64: 128, 8>}, {pipeline_mode = #tpu.pipeline_mode<synchronous>, transform_indices = @transform_2, window_bounds = array<i64: 8, 32>}, {pipeline_mode = #tpu.pipeline_mode<synchronous>, transform_indices = @transform_3, window_bounds = array<i64: 1, 32>}, {transform_indices = @transform_4, window_bounds = array<i64: 128, 32>}]} {
    %c0_i32 = arith.constant 0 : i32
    %0 = arith.cmpi eq, %arg1, %c0_i32 : i32
    %1 = arith.extui %0 : i1 to i32
    %c0_i32_0 = arith.constant 0 : i32
    %2 = arith.cmpi ne, %1, %c0_i32_0 : i32
    scf.if %2 {
      %cst_13 = arith.constant 0.000000e+00 : f32
      %15 = vector.broadcast %cst_13 : f32 to vector<128x32xf32>
      %c0_14 = arith.constant 0 : index
      %c0_15 = arith.constant 0 : index
      %16 = vector.load %arg7[%c0_14, %c0_15] : memref<128x32xf32, #tpu.memory_space<vmem>>, vector<128x32xf32>
      tpu.vector_store %arg7[%c0_14, %c0_15], %15 {strides = array<i32>} : memref<128x32xf32, #tpu.memory_space<vmem>>, vector<128x32xf32>,
    } else {
    }
    %c0 = arith.constant 0 : index
    %c0_1 = arith.constant 0 : index
    %3 = vector.load %arg3[%c0, %c0_1] : memref<128x8xbf16, #tpu.memory_space<vmem>>, vector<128x8xbf16>
    %c0_2 = arith.constant 0 : index
    %c0_3 = arith.constant 0 : index
    %4 = vector.load %arg4[%c0_2, %c0_3] : memref<8x32xbf16, #tpu.memory_space<vmem>>, vector<8x32xbf16>
    %cst = arith.constant dense<0.000000e+00> : vector<128x32xf32>
    %5 = tpu.matmul %3, %4, %cst {dimension_numbers = #tpu.dot_dimension_numbers<[1], [0], [0], [1], [0, 0, 1, 1], [], []>} : vector<128x8xbf16>, vector<8x32xbf16>, vector<128x32xf32> -> vector<128x32xf32>
    %6 = arith.truncf %5 : vector<128x32xf32> to vector<128x32xbf16>
    %c0_4 = arith.constant 0 : index
    %c0_5 = arith.constant 0 : index
    %7 = vector.load %arg7[%c0_4, %c0_5] : memref<128x32xf32, #tpu.memory_space<vmem>>, vector<128x32xf32>
    %c0_6 = arith.constant 0 : index
    %c0_7 = arith.constant 0 : index
    %8 = vector.load %arg2[%c0_6, %c0_7] : memref<128x128xbf16, #tpu.memory_space<vmem>>, vector<128x128xbf16>
    %cst_8 = arith.constant dense<0.000000e+00> : vector<128x32xf32>
    %9 = tpu.matmul %8, %6, %cst_8 {dimension_numbers = #tpu.dot_dimension_numbers<[1], [0], [0], [1], [0, 0, 1, 1], [], []>} : vector<128x128xbf16>, vector<128x32xbf16>, vector<128x32xf32> -> vector<128x32xf32>
    %10 = arith.addf %7, %9 : vector<128x32xf32>
    %c0_9 = arith.constant 0 : index
    %c0_10 = arith.constant 0 : index
    %11 = vector.load %arg7[%c0_9, %c0_10] : memref<128x32xf32, #tpu.memory_space<vmem>>, vector<128x32xf32>
    tpu.vector_store %arg7[%c0_9, %c0_10], %10 {strides = array<i32>} : memref<128x32xf32, #tpu.memory_space<vmem>>, vector<128x32xf32>,
    %c0_i32_11 = arith.constant 0 : i32
    %12 = arith.cmpi eq, %arg1, %c0_i32_11 : i32
    %13 = arith.extui %12 : i1 to i32
    %c0_i32_12 = arith.constant 0 : i32
    %14 = arith.cmpi ne, %13, %c0_i32_12 : i32
    scf.if %14 {
      %c0_13 = arith.constant 0 : index
      %c0_14 = arith.constant 0 : index
      %15 = vector.load %arg7[%c0_13, %c0_14] : memref<128x32xf32, #tpu.memory_space<vmem>>, vector<128x32xf32>
      %c0_15 = arith.constant 0 : index
      %c0_16 = arith.constant 0 : index
      %16 = vector.load %arg5[%c0_15, %c0_16] : memref<1x32xf32, #tpu.memory_space<vmem>>, vector<1x32xf32>
      %17 = vector.broadcast %16 : vector<1x32xf32> to vector<128x32xf32>
      %18 = arith.addf %15, %17 : vector<128x32xf32>
      %cst_17 = arith.constant 0.000000e+00 : f32
      %19 = vector.broadcast %cst_17 : f32 to vector<128x32xf32>
      %20 = arith.maximumf %18, %19 : vector<128x32xf32>
      %21 = arith.truncf %20 : vector<128x32xf32> to vector<128x32xbf16>
      %c0_18 = arith.constant 0 : index
      %c0_19 = arith.constant 0 : index
      %22 = vector.load %arg6[%c0_18, %c0_19] : memref<128x32xbf16, #tpu.memory_space<vmem>>, vector<128x32xbf16>
      tpu.vector_store %arg6[%c0_18, %c0_19], %21 {strides = array<i32>} : memref<128x32xbf16, #tpu.memory_space<vmem>>, vector<128x32xbf16>,
    } else {
    }
    return
  }
  func.func @transform_0(%arg0: i32, %arg1: i32) -> (i32, i32) {
    %c0_i32 = arith.constant 0 : i32
    return %arg0, %arg1 : i32, i32
  }
  func.func @transform_1(%arg0: i32, %arg1: i32) -> (i32, i32) {
    %c0_i32 = arith.constant 0 : i32
    %c0_i32_0 = arith.constant 0 : i32
    return %arg1, %c0_i32 : i32, i32
  }
  func.func @transform_2(%arg0: i32, %arg1: i32) -> (i32, i32) {
    %c0_i32 = arith.constant 0 : i32
    %c0_i32_0 = arith.constant 0 : i32
    %c0_i32_1 = arith.constant 0 : i32
    return %c0_i32, %c0_i32_0 : i32, i32
  }
  func.func @transform_3(%arg0: i32, %arg1: i32) -> (i32, i32) {
    %c0_i32 = arith.constant 0 : i32
    %c0_i32_0 = arith.constant 0 : i32
    %c0_i32_1 = arith.constant 0 : i32
    return %c0_i32, %c0_i32_0 : i32, i32
  }
  func.func @transform_4(%arg0: i32, %arg1: i32) -> (i32, i32) {
    %c0_i32 = arith.constant 0 : i32
    %c0_i32_0 = arith.constant 0 : i32
    return %arg0, %c0_i32 : i32, i32
  }
}

</mosaic_0001>

<bundles_post_ra>
// kernel: tpu_custom_call.1
= control target key start
LH: loop header
LB: loop body
LE: loop exit
PB: predicated region body
PF: predicated region fallthrough
CT: control target
= control target key end

     0   :  { %vm121_vm0 = vcmask 1043456   ;;  %vm96_vm1 = vcmask 64512   ;;  %vm22_vm2 = vcmask 261120   ;;  %v535_v38 = vmov 0.0   ;;  %s729_s2 = inlined_call_operand.vmem [shape: bf16[8,32], index: 2, kind: input, shape index: {}]   ;;  %s730_s1 = inlined_call_operand.vmem [shape: bf16[128,8], index: 1, kind: input, shape index: {}]   ;;  %s731_s3 = inlined_call_operand.vmem [shape: f32[1,32], index: 3, kind: input, shape index: {}]   ;;  %s732_s0 = inlined_call_operand.vmem [shape: bf16[128,128], index: 0, kind: input, shape index: {}]   ;;  %s733_s4 = inlined_call_operand.vmem [shape: bf16[128,32], index: 4, kind: output, shape index: {}]  }
   0x1   :  { %v55_v0 = vld [vmem:[%s729_s2] sm:$0xf]  ;;  %v513_v3 = vld [vmem:[%s730_s1 + $0x28] sm:$0xff]  ;;  %v514_v5 = vld [vmem:[%s730_s1 + $0x30] sm:$0xff]  ;;  %23 = vst.msk [vmem:[#allocation2] sm:$0xff] %vm22_vm2, %v535_v38  ;;  %vm415_vm3 = vcmask 257024  }
   0x2   :  { %v123_v1 = vsel %vm121_vm0, %v55_v0, 0  ;;  %v508_v2 = vld [vmem:[%s730_s1] sm:$0xff]  ;;  %v509_v4 = vld [vmem:[%s730_s1 + $0x8] sm:$0xff]  ;;  %v510_v6 = vld [vmem:[%s730_s1 + $0x10] sm:$0xff]  ;;  %24 = vst.msk [vmem:[#allocation2 + $0x8] sm:$0xff] %vm22_vm2, %v535_v38 }
   0x3   :  { %132 = vmatpush.bf16.msra.mxu0 %v123_v1  ;;  %524 = vmatpush.bf16.msra.mxu3 %v123_v1  ;;  %v515_v7 = vld [vmem:[%s730_s1 + $0x38] sm:$0xff]  ;;  %v512_v9 = vld [vmem:[%s730_s1 + $0x20] sm:$0xff]  ;;  %v517_v36 = vld [vmem:[%s732_s0 + $0x8] sm:$0xff]  ;;  %25 = vst.msk [vmem:[#allocation2 + $0x10] sm:$0xff] %vm22_vm2, %v535_v38 }
   0x4   :  { %v511_v8 = vld [vmem:[%s730_s1 + $0x18] sm:$0xff]  ;;  %v516_v34 = vld [vmem:[%s732_s0] sm:$0xff]  ;;  %v521_v37 = vld [vmem:[%s732_s0 + $0x28] sm:$0xff]  ;;  %26 = vst.msk [vmem:[#allocation2 + $0x18] sm:$0xff] %vm22_vm2, %v535_v38 }
   0x5   :  { %v520_v35 = vld [vmem:[%s732_s0 + $0x20] sm:$0xff]  ;;  %27 = vst.msk [vmem:[#allocation2 + $0x20] sm:$0xff] %vm22_vm2, %v535_v38  ;;  %v518_v39 = vld [vmem:[%s732_s0 + $0x10] sm:$0xff]  ;;  %v519_v41 = vld [vmem:[%s732_s0 + $0x18] sm:$0xff] }
   0x6   :  { %468 = vmatmul.msk.bf16.vlgmr.msra.gmra.mxu0 %vm96_vm1, %v508_v2  ;;  %473 = vmatmul.msk.bf16.vlgmr.msra.gmra.mxu3 %vm96_vm1, %v513_v3  ;;  %28 = vst.msk [vmem:[#allocation2 + $0x28] sm:$0xff] %vm22_vm2, %v535_v38  ;;  %v522_v40 = vld [vmem:[%s732_s0 + $0x30] sm:$0xff]  ;;  %v523_v42 = vld [vmem:[%s732_s0 + $0x38] sm:$0xff]  ;;  %v632_v49 = vld [vmem:[%s731_s3] ss:$0 sm:$0xff] }
   0x7   :  { %29 = vst.msk [vmem:[#allocation2 + $0x30] sm:$0xff] %vm22_vm2, %v535_v38 }
   0x8   :  { %30 = vst.msk [vmem:[#allocation2 + $0x38] sm:$0xff] %vm22_vm2, %v535_v38  ;;  %v182_v43 = vld [vmem:[#allocation2] sm:$0xff] }
   0x9   :  { %31 = vst.msk [vmem:[#allocation2 + $0x40] sm:$0xff] %vm22_vm2, %v535_v38  ;;  %v183_v48 = vld [vmem:[#allocation2 + $0x8] sm:$0xff] }
   0xa   :  { %32 = vst.msk [vmem:[#allocation2 + $0x48] sm:$0xff] %vm22_vm2, %v535_v38  ;;  %v184_v58 = vld [vmem:[#allocation2 + $0x10] sm:$0xff] }
   0xb   :  { %33 = vst.msk [vmem:[#allocation2 + $0x50] sm:$0xff] %vm22_vm2, %v535_v38 }
   0xc   :  { %34 = vst.msk [vmem:[#allocation2 + $0x58] sm:$0xff] %vm22_vm2, %v535_v38 }
   0xd   :  { %35 = vst.msk [vmem:[#allocation2 + $0x60] sm:$0xff] %vm22_vm2, %v535_v38 }
   0xe   :  { %36 = vst.msk [vmem:[#allocation2 + $0x68] sm:$0xff] %vm22_vm2, %v535_v38 }
   0xf   :  { %37 = vst.msk [vmem:[#allocation2 + $0x70] sm:$0xff] %vm22_vm2, %v535_v38 }
  0x10   :  { %38 = vst.msk [vmem:[#allocation2 + $0x78] sm:$0xff] %vm22_vm2, %v535_v38  ;;  %v190_v46 = vld [vmem:[#allocation2 + $0x40] sm:$0xff] }
  0x11   :  { %v191_v55 = vld [vmem:[#allocation2 + $0x48] sm:$0xff] }
  0x16   :  { %469 = vmatmul.msk.bf16.gmra.mxu0 %vm96_vm1, %v509_v4  ;;  %474 = vmatmul.msk.bf16.gmra.mxu3 %vm96_vm1, %v514_v5  ;;  %v192_v4 = vld [vmem:[#allocation2 + $0x50] sm:$0xff] }
  0x26   :  { %470 = vmatmul.msk.bf16.gmra.mxu0 %vm96_vm1, %v510_v6  ;;  %475 = vmatmul.msk.bf16.gmra.mxu3 %vm96_vm1, %v515_v7 }
  0x36   :  { %471 = vmatmul.msk.bf16.gmra.mxu0 %vm96_vm1, %v511_v8  ;;  %v185_v8 = vld [vmem:[#allocation2 + $0x18] sm:$0xff] }
  0x46   :  { %472 = vmatmul.msk.bf16.gmra.mxu0 %vm96_vm1, %v512_v9 }
  0x83   :  { %v134_v10 = vpop.f32.mrf.mxu0 }
  0x89   :  { %v159_v11 = vpop.f32.mrf.mxu3 }
  0x8b   :  { %v136_v12 = vpop.f32.mrf.mxu0 }
  0x8c   :  { %v174_v13 = vpack.c.bf16 %v136_v12, %v134_v10 }
  0x91   :  { %v161_v14 = vpop.f32.mrf.mxu3 }
  0x92   :  { %v179_v26 = vpack.c.bf16 %v161_v14, %v159_v11 }
  0x93   :  { %v139_v15 = vpop.f32.mrf.mxu0 }
  0x99   :  { %v164_v16 = vpop.f32.mrf.mxu3 }
  0x9b   :  { %v141_v17 = vpop.f32.mrf.mxu0 }
  0x9c   :  { %v175_v33 = vpack.c.bf16 %v141_v17, %v139_v15 }
  0xa1   :  { %v166_v18 = vpop.f32.mrf.mxu3 }
  0xa2   :  { %v180_v25 = vpack.c.bf16 %v166_v18, %v164_v16  ;;  %v193_v18 = vld [vmem:[#allocation2 + $0x58] sm:$0xff] }
  0xa3   :  { %v144_v19 = vpop.f32.mrf.mxu0 }
  0xa9   :  { %v169_v20 = vpop.f32.mrf.mxu3 }
  0xab   :  { %v146_v21 = vpop.f32.mrf.mxu0 }
  0xac   :  { %v176_v32 = vpack.c.bf16 %v146_v21, %v144_v19 }
  0xb1   :  { %v171_v22 = vpop.f32.mrf.mxu3 }
  0xb2   :  { %v181_v23 = vpack.c.bf16 %v171_v22, %v169_v20  ;;  %v186_v22 = vld [vmem:[#allocation2 + $0x20] sm:$0xff] }
  0xb3   :  { %v149_v24 = vpop.f32.mrf.mxu0 }
  0xb4   :  { %262 = vmatpush.bf16.msra.mxu1 %v181_v23  ;;  %525 = vmatpush.bf16.msra.mxu2 %v181_v23 }
  0xb8   :  { %263 = vmatpush.bf16.msra.mxu1 %v180_v25  ;;  %526 = vmatpush.bf16.msra.mxu2 %v180_v25 }
  0xbb   :  { %v151_v27 = vpop.f32.mrf.mxu0 }
  0xbc   :  { %264 = vmatpush.bf16.msra.mxu1 %v179_v26  ;;  %527 = vmatpush.bf16.msra.mxu2 %v179_v26  ;;  %v177_v31 = vpack.c.bf16 %v151_v27, %v149_v24 }
  0xc3   :  { %v154_v28 = vpop.f32.mrf.mxu0 }
  0xcb   :  { %v156_v29 = vpop.f32.mrf.mxu0 }
  0xcc   :  { %v178_v30 = vpack.c.bf16 %v156_v29, %v154_v28 }
  0xce   :  { %265 = vmatpush.bf16.msra.mxu1 %v178_v30  ;;  %528 = vmatpush.bf16.msra.mxu2 %v178_v30 }
  0xd2   :  { %266 = vmatpush.bf16.msra.mxu1 %v177_v31  ;;  %529 = vmatpush.bf16.msra.mxu2 %v177_v31 }
  0xd6   :  { %267 = vmatpush.bf16.msra.mxu1 %v176_v32  ;;  %530 = vmatpush.bf16.msra.mxu2 %v176_v32  ;;  %v194_v32 = vld [vmem:[#allocation2 + $0x60] sm:$0xff] }
  0xda   :  { %268 = vmatpush.bf16.msra.mxu1 %v175_v33  ;;  %531 = vmatpush.bf16.msra.mxu2 %v175_v33 }
  0xde   :  { %269 = vmatpush.bf16.msra.mxu1 %v174_v13  ;;  %532 = vmatpush.bf16.msra.mxu2 %v174_v13 }
  0xe1   :  { %270 = vmatmul.bf16.vlgmr.msra.gmra.mxu1 %v516_v34  ;;  %290 = vmatmul.bf16.vlgmr.msra.gmra.mxu2 %v520_v35 }
  0xf1   :  { %275 = vmatmul.bf16.gmra.mxu1 %v517_v36  ;;  %295 = vmatmul.bf16.gmra.mxu2 %v521_v37  ;;  %v187_v36 = vld [vmem:[#allocation2 + $0x28] sm:$0xff] }
 0x101   :  { %280 = vmatmul.bf16.gmra.mxu1 %v518_v39  ;;  %300 = vmatmul.bf16.gmra.mxu2 %v522_v40 }
 0x111   :  { %285 = vmatmul.bf16.gmra.mxu1 %v519_v41  ;;  %305 = vmatmul.bf16.gmra.mxu2 %v523_v42 }
 0x15e   :  { %v271_v44 = vpop.f32.mrf.mxu1 }
 0x15f   :  { %v311_v45 = vadd.f32 %v271_v44, %v182_v43 }
 0x161   :  { %328 = vst.msk [vmem:[#allocation2] sm:$0xff] %vm22_vm2, %v311_v45 }
 0x164   :  { %v291_v47 = vpop.f32.mrf.mxu2 }
 0x165   :  { %v319_v50 = vadd.f32 %v291_v47, %v190_v46  ;;  %v195_v46 = vld [vmem:[#allocation2 + $0x68] sm:$0xff] }
 0x166   :  { %v273_v51 = vpop.f32.mrf.mxu1 }
 0x167   :  { %336 = vst.msk [vmem:[#allocation2 + $0x40] sm:$0xff] %vm22_vm2, %v319_v50  ;;  %v312_v52 = vadd.f32 %v273_v51, %v183_v48  ;;  %v188_v51 = vld [vmem:[#allocation2 + $0x30] sm:$0xff] }
 0x168   :  { %v347_v53 = vld [vmem:[#allocation2] sm:$0xff] }
 0x169   :  { %v367_v54 = vadd.f32 %v632_v49, %v347_v53  ;;  %329 = vst.msk [vmem:[#allocation2 + $0x8] sm:$0xff] %vm22_vm2, %v312_v52 }
 0x16b   :  { %v383_v56 = vmax.f32 %v367_v54, 0.0 }
 0x16c   :  { %v293_v57 = vpop.f32.mrf.mxu2 }
 0x16d   :  { %v399_v59 = vpack.c.bf16 %v383_v56, %v383_v56  ;;  %v320_v60 = vadd.f32 %v293_v57, %v191_v55 }
 0x16e   :  { %v355_v61 = vld [vmem:[#allocation2 + $0x40] sm:$0xff]  ;;  %v276_v62 = vpop.f32.mrf.mxu1 }
 0x16f   :  { %416 = vst.msk [vmem:[%s733_s4] sm:$0xf] %vm415_vm3, %v399_v59  ;;  %v375_v63 = vadd.f32 %v632_v49, %v355_v61  ;;  %v313_v0 = vadd.f32 %v276_v62, %v184_v58  ;;  %v196_v61 = vld [vmem:[#allocation2 + $0x70] sm:$0xff] }
 0x170   :  { %v348_v1 = vld [vmem:[#allocation2 + $0x8] sm:$0xff]  ;;  %337 = vst.msk [vmem:[#allocation2 + $0x48] sm:$0xff] %vm22_vm2, %v320_v60 }
 0x171   :  { %v391_v2 = vmax.f32 %v375_v63, 0.0  ;;  %v368_v3 = vadd.f32 %v632_v49, %v348_v1  ;;  %330 = vst.msk [vmem:[#allocation2 + $0x10] sm:$0xff] %vm22_vm2, %v313_v0  ;;  %v189_v1 = vld [vmem:[#allocation2 + $0x38] sm:$0xff] }
 0x173   :  { %v407_v5 = vpack.c.bf16 %v391_v2, %v391_v2  ;;  %v384_v6 = vmax.f32 %v368_v3, 0.0 }
 0x174   :  { %v296_v7 = vpop.f32.mrf.mxu2 }
 0x175   :  { %424 = vst.msk [vmem:[%s733_s4 + $0x20] sm:$0xf] %vm415_vm3, %v407_v5  ;;  %v400_v9 = vpack.c.bf16 %v384_v6, %v384_v6  ;;  %v321_v10 = vadd.f32 %v296_v7, %v192_v4 }
 0x176   :  { %v278_v11 = vpop.f32.mrf.mxu1 }
 0x177   :  { %417 = vst.msk [vmem:[%s733_s4 + $0x4] sm:$0xf] %vm415_vm3, %v400_v9  ;;  %v356_v12 = vld [vmem:[#allocation2 + $0x48] sm:$0xff]  ;;  %v314_v13 = vadd.f32 %v278_v11, %v185_v8  ;;  %v197_v11 = vld [vmem:[#allocation2 + $0x78] sm:$0xff] }
 0x178   :  { %v376_v14 = vadd.f32 %v632_v49, %v356_v12  ;;  %v349_v15 = vld [vmem:[#allocation2 + $0x10] sm:$0xff]  ;;  %338 = vst.msk [vmem:[#allocation2 + $0x50] sm:$0xff] %vm22_vm2, %v321_v10 }
 0x179   :  { %v369_v16 = vadd.f32 %v632_v49, %v349_v15  ;;  %331 = vst.msk [vmem:[#allocation2 + $0x18] sm:$0xff] %vm22_vm2, %v314_v13 }
 0x17a   :  { %v392_v17 = vmax.f32 %v376_v14, 0.0 }
 0x17b   :  { %v385_v19 = vmax.f32 %v369_v16, 0.0 }
 0x17c   :  { %v408_v20 = vpack.c.bf16 %v392_v17, %v392_v17  ;;  %v298_v21 = vpop.f32.mrf.mxu2 }
 0x17d   :  { %v401_v23 = vpack.c.bf16 %v385_v19, %v385_v19  ;;  %v322_v24 = vadd.f32 %v298_v21, %v193_v18 }
 0x17e   :  { %425 = vst.msk [vmem:[%s733_s4 + $0x24] sm:$0xf] %vm415_vm3, %v408_v20  ;;  %v281_v25 = vpop.f32.mrf.mxu1 }
 0x17f   :  { %418 = vst.msk [vmem:[%s733_s4 + $0x8] sm:$0xf] %vm415_vm3, %v401_v23  ;;  %v357_v26 = vld [vmem:[#allocation2 + $0x50] sm:$0xff]  ;;  %v315_v27 = vadd.f32 %v281_v25, %v186_v22 }
 0x180   :  { %v377_v28 = vadd.f32 %v632_v49, %v357_v26  ;;  %v350_v29 = vld [vmem:[#allocation2 + $0x18] sm:$0xff]  ;;  %339 = vst.msk [vmem:[#allocation2 + $0x58] sm:$0xff] %vm22_vm2, %v322_v24 }
 0x181   :  { %v370_v30 = vadd.f32 %v632_v49, %v350_v29  ;;  %332 = vst.msk [vmem:[#allocation2 + $0x20] sm:$0xff] %vm22_vm2, %v315_v27 }
 0x182   :  { %v393_v31 = vmax.f32 %v377_v28, 0.0 }
 0x183   :  { %v386_v33 = vmax.f32 %v370_v30, 0.0 }
 0x184   :  { %v409_v34 = vpack.c.bf16 %v393_v31, %v393_v31  ;;  %v301_v35 = vpop.f32.mrf.mxu2 }
 0x185   :  { %v402_v37 = vpack.c.bf16 %v386_v33, %v386_v33  ;;  %v323_v38 = vadd.f32 %v301_v35, %v194_v32 }
 0x186   :  { %426 = vst.msk [vmem:[%s733_s4 + $0x28] sm:$0xf] %vm415_vm3, %v409_v34  ;;  %v283_v39 = vpop.f32.mrf.mxu1 }
 0x187   :  { %419 = vst.msk [vmem:[%s733_s4 + $0xc] sm:$0xf] %vm415_vm3, %v402_v37  ;;  %v358_v40 = vld [vmem:[#allocation2 + $0x58] sm:$0xff]  ;;  %v316_v41 = vadd.f32 %v283_v39, %v187_v36 }
 0x188   :  { %v378_v42 = vadd.f32 %v632_v49, %v358_v40  ;;  %v351_v43 = vld [vmem:[#allocation2 + $0x20] sm:$0xff]  ;;  %340 = vst.msk [vmem:[#allocation2 + $0x60] sm:$0xff] %vm22_vm2, %v323_v38 }
 0x189   :  { %v371_v44 = vadd.f32 %v632_v49, %v351_v43  ;;  %333 = vst.msk [vmem:[#allocation2 + $0x28] sm:$0xff] %vm22_vm2, %v316_v41 }
 0x18a   :  { %v394_v45 = vmax.f32 %v378_v42, 0.0 }
 0x18b   :  { %v387_v47 = vmax.f32 %v371_v44, 0.0 }
 0x18c   :  { %v410_v48 = vpack.c.bf16 %v394_v45, %v394_v45  ;;  %v303_v50 = vpop.f32.mrf.mxu2 }
 0x18d   :  { %v403_v52 = vpack.c.bf16 %v387_v47, %v387_v47  ;;  %v324_v53 = vadd.f32 %v303_v50, %v195_v46 }
 0x18e   :  { %427 = vst.msk [vmem:[%s733_s4 + $0x2c] sm:$0xf] %vm415_vm3, %v410_v48  ;;  %v286_v54 = vpop.f32.mrf.mxu1 }
 0x18f   :  { %420 = vst.msk [vmem:[%s733_s4 + $0x10] sm:$0xf] %vm415_vm3, %v403_v52  ;;  %v359_v55 = vld [vmem:[#allocation2 + $0x60] sm:$0xff]  ;;  %v317_v56 = vadd.f32 %v286_v54, %v188_v51 }
 0x190   :  { %v379_v57 = vadd.f32 %v632_v49, %v359_v55  ;;  %v352_v58 = vld [vmem:[#allocation2 + $0x28] sm:$0xff]  ;;  %341 = vst.msk [vmem:[#allocation2 + $0x68] sm:$0xff] %vm22_vm2, %v324_v53 }
 0x191   :  { %v372_v59 = vadd.f32 %v632_v49, %v352_v58  ;;  %334 = vst.msk [vmem:[#allocation2 + $0x30] sm:$0xff] %vm22_vm2, %v317_v56 }
 0x192   :  { %v395_v60 = vmax.f32 %v379_v57, 0.0 }
 0x193   :  { %v388_v62 = vmax.f32 %v372_v59, 0.0 }
 0x194   :  { %v411_v63 = vpack.c.bf16 %v395_v60, %v395_v60  ;;  %v306_v0 = vpop.f32.mrf.mxu2 }
 0x195   :  { %v404_v2 = vpack.c.bf16 %v388_v62, %v388_v62  ;;  %v325_v3 = vadd.f32 %v306_v0, %v196_v61 }
 0x196   :  { %428 = vst.msk [vmem:[%s733_s4 + $0x30] sm:$0xf] %vm415_vm3, %v411_v63  ;;  %v288_v4 = vpop.f32.mrf.mxu1 }
 0x197   :  { %421 = vst.msk [vmem:[%s733_s4 + $0x14] sm:$0xf] %vm415_vm3, %v404_v2  ;;  %v360_v5 = vld [vmem:[#allocation2 + $0x68] sm:$0xff]  ;;  %v318_v6 = vadd.f32 %v288_v4, %v189_v1 }
 0x198   :  { %v380_v7 = vadd.f32 %v632_v49, %v360_v5  ;;  %v353_v8 = vld [vmem:[#allocation2 + $0x30] sm:$0xff]  ;;  %342 = vst.msk [vmem:[#allocation2 + $0x70] sm:$0xff] %vm22_vm2, %v325_v3 }
 0x199   :  { %v373_v9 = vadd.f32 %v632_v49, %v353_v8  ;;  %335 = vst.msk [vmem:[#allocation2 + $0x38] sm:$0xff] %vm22_vm2, %v318_v6 }
 0x19a   :  { %v396_v10 = vmax.f32 %v380_v7, 0.0 }
 0x19b   :  { %v389_v12 = vmax.f32 %v373_v9, 0.0 }
 0x19c   :  { %v412_v13 = vpack.c.bf16 %v396_v10, %v396_v10  ;;  %v308_v14 = vpop.f32.mrf.mxu2 }
 0x19d   :  { %v405_v15 = vpack.c.bf16 %v389_v12, %v389_v12  ;;  %v326_v16 = vadd.f32 %v308_v14, %v197_v11 }
 0x19e   :  { %429 = vst.msk [vmem:[%s733_s4 + $0x34] sm:$0xf] %vm415_vm3, %v412_v13 }
 0x19f   :  { %422 = vst.msk [vmem:[%s733_s4 + $0x18] sm:$0xf] %vm415_vm3, %v405_v15  ;;  %v361_v17 = vld [vmem:[#allocation2 + $0x70] sm:$0xff] }
 0x1a0   :  { %v381_v18 = vadd.f32 %v632_v49, %v361_v17  ;;  %v354_v19 = vld [vmem:[#allocation2 + $0x38] sm:$0xff]  ;;  %343 = vst.msk [vmem:[#allocation2 + $0x78] sm:$0xff] %vm22_vm2, %v326_v16 }
 0x1a1   :  { %v374_v20 = vadd.f32 %v632_v49, %v354_v19 }
 0x1a2   :  { %v397_v21 = vmax.f32 %v381_v18, 0.0 }
 0x1a3   :  { %v390_v22 = vmax.f32 %v374_v20, 0.0 }
 0x1a4   :  { %v413_v23 = vpack.c.bf16 %v397_v21, %v397_v21 }
 0x1a5   :  { %v406_v24 = vpack.c.bf16 %v390_v22, %v390_v22 }
 0x1a6   :  { %430 = vst.msk [vmem:[%s733_s4 + $0x38] sm:$0xf] %vm415_vm3, %v413_v23 }
 0x1a7   :  { %423 = vst.msk [vmem:[%s733_s4 + $0x1c] sm:$0xf] %vm415_vm3, %v406_v24  ;;  %v362_v25 = vld [vmem:[#allocation2 + $0x78] sm:$0xff] }
 0x1a8   :  { %v382_v26 = vadd.f32 %v632_v49, %v362_v25 }
 0x1aa   :  { %v398_v27 = vmax.f32 %v382_v26, 0.0 }
 0x1ac   :  { %v414_v28 = vpack.c.bf16 %v398_v27, %v398_v27 }
 0x1ae   :  { %431 = vst.msk [vmem:[%s733_s4 + $0x3c] sm:$0xf] %vm415_vm3, %v414_v28 }

</bundles_post_ra>
